<compile_context>
chip_gen: v7x
topology: tpu7x:2x2x1
jax: 0.10.0
libtpu: 0.0.40
codegen_flags: <defaults>
</compile_context>

<pallas_src>
import jax
import jax.numpy as jnp
from jax.experimental import pallas as pl
from jax.experimental.pallas import tpu as pltpu


def decoder_kernel(z_ref, w1_ref, b1_ref, w2_ref, b2_ref, out_ref):
    # linear1 on the MXU (f32 accumulation), bias + ReLU in f32.
    h = jnp.dot(z_ref[...], w1_ref[...], preferred_element_type=jnp.float32)
    h = jnp.maximum(h + b1_ref[...], 0.0)                       # [TB, H_pad] f32
    # linear2: activations cast to the matmul dtype, accumulate in f32.
    logits = jnp.dot(h.astype(w2_ref.dtype), w2_ref[...],
                     preferred_element_type=jnp.float32) + b2_ref[...]
    # sigmoid in f32 (exp runs on the EUP slot); lane-dense store (F % 128 == 0).
    out_ref[...] = jax.nn.sigmoid(logits).astype(out_ref.dtype)


def _round_up(x, m):
    return (x + m - 1) // m * m


def decoder_forward(z, params, *, block_b=512, matmul_dtype=jnp.bfloat16,
                    out_dtype=jnp.float32):
    """z: [B, latent_dims]; params with w1:[L,H], b1:[1,H], w2:[H,F], b2:[1,F]
    (nn.Linear weights already transposed to [in, out]).  Returns
    sigmoid(relu(z @ W1 + b1) @ W2 + b2) as [B, F] in `out_dtype`."""
    B, L = z.shape
    H = params["w1"].shape[1]
    F_out = params["w2"].shape[1]

    # ---- parameter prep (weight-sized, cheap) ------------------------------
    # Zero-pad the hidden dim to a full lane width: numerically identical and
    # makes the intermediate activation lane-dense / MXU K-dense.
    H_pad = _round_up(H, 128)
    w1, b1, w2 = params["w1"], params["b1"], params["w2"]
    if H_pad != H:
        w1 = jnp.pad(w1, ((0, 0), (0, H_pad - H)))
        b1 = jnp.pad(b1, ((0, 0), (0, H_pad - H)))
        w2 = jnp.pad(w2, ((0, H_pad - H), (0, 0)))
    w1 = w1.astype(matmul_dtype)
    w2 = w2.astype(matmul_dtype)
    b1 = b1.astype(jnp.float32)
    b2 = params["b2"].astype(jnp.float32)
    # Single cast of z to the matmul dtype (no intermediate f32 pass).
    z_mm = z if z.dtype == jnp.dtype(matmul_dtype) else z.astype(matmul_dtype)

    # ---- batch tiling: no wrapper pad/slice, Pallas masks the ragged block --
    if B < 8:
        TB = B                                   # full-extent block, no masking
    else:
        TB = min(block_b, _round_up(B, 8))       # multiple of 8 sublanes
        if B >= 16:
            # v7x: guarantee >= 2 grid steps so both TensorCores are used.
            TB = min(TB, _round_up(pl.cdiv(B, 2), 8))
    nb = pl.cdiv(B, TB)

    itm = jnp.dtype(matmul_dtype).itemsize
    out_itm = jnp.dtype(out_dtype).itemsize
    cost = pl.CostEstimate(
        flops=2 * B * L * H_pad + 2 * B * H_pad * F_out,
        transcendentals=B * F_out,                       # sigmoid -> exp
        bytes_accessed=(B * L * itm + L * H_pad * itm + H_pad * 4
                        + H_pad * F_out * itm + F_out * 4
                        + B * F_out * out_itm),
    )

    out = pl.pallas_call(
        decoder_kernel,
        out_shape=jax.ShapeDtypeStruct((B, F_out), out_dtype),
        grid=(nb,),
        in_specs=[
            pl.BlockSpec((TB, L), lambda i: (i, 0)),         # z tile (per batch block)
            pl.BlockSpec((L, H_pad), lambda i: (0, 0)),      # W1 (grid-invariant)
            pl.BlockSpec((1, H_pad), lambda i: (0, 0)),      # b1
            pl.BlockSpec((H_pad, F_out), lambda i: (0, 0)),  # W2 (grid-invariant)
            pl.BlockSpec((1, F_out), lambda i: (0, 0)),      # b2
        ],
        out_specs=pl.BlockSpec((TB, F_out), lambda i: (i, 0)),
        compiler_params=pltpu.CompilerParams(
            dimension_semantics=("parallel",),               # batch tiles independent
            vmem_limit_bytes=32 * 1024 * 1024,               # covers TB=512 on v5e too
        ),
        cost_estimate=cost,
    )(z_mm, w1, b1, w2, b2)
    return out


def init_params(key, latent_dims, hidden_features, num_features):
    """Deterministic synthetic parameters shaped like the torch module
    (nn.Linear weight [out, in] stored transposed as [in, out])."""
    k1, k2, k3, k4 = jax.random.split(key, 4)
    s1 = 1.0 / jnp.sqrt(latent_dims)
    s2 = 1.0 / jnp.sqrt(hidden_features)
    return {
        "w1": jax.random.uniform(k1, (latent_dims, hidden_features), jnp.float32, -s1, s1),
        "b1": jax.random.uniform(k2, (1, hidden_features), jnp.float32, -s1, s1),
        "w2": jax.random.uniform(k3, (hidden_features, num_features), jnp.float32, -s2, s2),
        "b2": jax.random.uniform(k4, (1, num_features), jnp.float32, -s2, s2),
    }


def _reference(z, params):
    h = jnp.maximum(z @ params["w1"] + params["b1"], 0.0)
    return jax.nn.sigmoid(h @ params["w2"] + params["b2"])


if __name__ == "__main__":
    # Small shapes consistent with the module: decoder maps latent -> flat
    # image features (C*H*W = 4*16*16 = 1024, lane-dense multiple of 128).
    B = 2
    latent_dims = 8
    hidden_features = 32
    num_features = 4 * 16 * 16

    key = jax.random.PRNGKey(0)
    kz, kp, kz2 = jax.random.split(key, 3)

    z = jax.random.normal(kz, (B, latent_dims), dtype=jnp.float32)
    params = init_params(kp, latent_dims, hidden_features, num_features)
    out_ref = _reference(z, params)

    # f32 matmul path: tight check against the pure-JAX reference.
    out_f32 = decoder_forward(z, params, matmul_dtype=jnp.float32)
    jax.block_until_ready(out_f32)
    assert out_f32.shape == (B, num_features)
    assert jnp.allclose(out_f32, out_ref, atol=1e-4, rtol=1e-4), "f32 path mismatch"

    # bf16 matmul path (f32 accumulation + f32 elementwise): loose tolerance.
    out_bf16 = decoder_forward(z, params, matmul_dtype=jnp.bfloat16)
    jax.block_until_ready(out_bf16)
    assert jnp.allclose(out_bf16, out_ref, atol=1e-2, rtol=1e-2), "bf16 path mismatch"

    # Optional bf16 output (halves HBM writeback); sigmoid still computed in f32.
    out_bf16_out = decoder_forward(z, params, matmul_dtype=jnp.bfloat16,
                                   out_dtype=jnp.bfloat16)
    jax.block_until_ready(out_bf16_out)
    assert out_bf16_out.dtype == jnp.bfloat16
    assert jnp.allclose(out_bf16_out.astype(jnp.float32), out_ref,
                        atol=2e-2, rtol=2e-2), "bf16-output path mismatch"

    # Larger, non-multiple-of-8 batch: exercises the ragged final block that
    # Pallas masks on writeback (two grid steps -> v7x megacore path).
    B2 = 100
    z2 = jax.random.normal(kz2, (B2, latent_dims), dtype=jnp.float32)
    out2_ref = _reference(z2, params)
    out2 = decoder_forward(z2, params, matmul_dtype=jnp.float32)
    jax.block_until_ready(out2)
    assert out2.shape == (B2, num_features)
    assert jnp.allclose(out2, out2_ref, atol=1e-4, rtol=1e-4), "ragged-batch mismatch"

    print("KERNEL_OK")
</pallas_src>

<mosaic_0001>
module attributes {stable_mosaic.version = 11 : i64} {
  func.func @decoder_kernel(%arg0: i32, %arg1: memref<2x8xf32, #tpu.memory_space<vmem>>, %arg2: memref<8x128xf32, #tpu.memory_space<vmem>>, %arg3: memref<1x128xf32, #tpu.memory_space<vmem>>, %arg4: memref<128x1024xf32, #tpu.memory_space<vmem>>, %arg5: memref<1x1024xf32, #tpu.memory_space<vmem>>, %arg6: memref<2x1024xf32, #tpu.memory_space<vmem>>) attributes {dimension_semantics = [#tpu.dimension_semantics<parallel>], iteration_bounds = array<i64: 1>, scalar_prefetch = 0 : i64, scratch_operands = 0 : i64, tpu.core_type = #tpu.core_type<tc>, window_params = [{transform_indices = @transform_0, window_bounds = array<i64: 2, 8>}, {pipeline_mode = #tpu.pipeline_mode<synchronous>, transform_indices = @transform_1, window_bounds = array<i64: 8, 128>}, {pipeline_mode = #tpu.pipeline_mode<synchronous>, transform_indices = @transform_2, window_bounds = array<i64: 1, 128>}, {pipeline_mode = #tpu.pipeline_mode<synchronous>, transform_indices = @transform_3, window_bounds = array<i64: 128, 1024>}, {pipeline_mode = #tpu.pipeline_mode<synchronous>, transform_indices = @transform_4, window_bounds = array<i64: 1, 1024>}, {transform_indices = @transform_5, window_bounds = array<i64: 2, 1024>}]} {
    %c0 = arith.constant 0 : index
    %c0_0 = arith.constant 0 : index
    %0 = vector.load %arg1[%c0, %c0_0] : memref<2x8xf32, #tpu.memory_space<vmem>>, vector<2x8xf32>
    %c0_1 = arith.constant 0 : index
    %c0_2 = arith.constant 0 : index
    %1 = vector.load %arg2[%c0_1, %c0_2] : memref<8x128xf32, #tpu.memory_space<vmem>>, vector<8x128xf32>
    %cst = arith.constant dense<0.000000e+00> : vector<2x128xf32>
    %2 = tpu.matmul %0, %1, %cst {dimension_numbers = #tpu.dot_dimension_numbers<[1], [0], [0], [1], [0, 0, 1, 1], [], []>} : vector<2x8xf32>, vector<8x128xf32>, vector<2x128xf32> -> vector<2x128xf32>
    %c0_3 = arith.constant 0 : index
    %c0_4 = arith.constant 0 : index
    %3 = vector.load %arg3[%c0_3, %c0_4] : memref<1x128xf32, #tpu.memory_space<vmem>>, vector<1x128xf32>
    %4 = vector.broadcast %3 : vector<1x128xf32> to vector<2x128xf32>
    %5 = arith.addf %2, %4 : vector<2x128xf32>
    %cst_5 = arith.constant 0.000000e+00 : f32
    %6 = vector.broadcast %cst_5 : f32 to vector<2x128xf32>
    %7 = arith.maximumf %5, %6 : vector<2x128xf32>
    %c0_6 = arith.constant 0 : index
    %c0_7 = arith.constant 0 : index
    %8 = vector.load %arg4[%c0_6, %c0_7] : memref<128x1024xf32, #tpu.memory_space<vmem>>, vector<128x1024xf32>
    %cst_8 = arith.constant dense<0.000000e+00> : vector<2x1024xf32>
    %9 = tpu.matmul %7, %8, %cst_8 {dimension_numbers = #tpu.dot_dimension_numbers<[1], [0], [0], [1], [0, 0, 1, 1], [], []>} : vector<2x128xf32>, vector<128x1024xf32>, vector<2x1024xf32> -> vector<2x1024xf32>
    %c0_9 = arith.constant 0 : index
    %c0_10 = arith.constant 0 : index
    %10 = vector.load %arg5[%c0_9, %c0_10] : memref<1x1024xf32, #tpu.memory_space<vmem>>, vector<1x1024xf32>
    %11 = vector.broadcast %10 : vector<1x1024xf32> to vector<2x1024xf32>
    %12 = arith.addf %9, %11 : vector<2x1024xf32>
    %13 = arith.negf %12 : vector<2x1024xf32>
    %14 = math.exp %13 : vector<2x1024xf32>
    %cst_11 = arith.constant 1.000000e+00 : f32
    %15 = vector.broadcast %cst_11 : f32 to vector<2x1024xf32>
    %16 = arith.addf %15, %14 : vector<2x1024xf32>
    %17 = arith.divf %15, %16 : vector<2x1024xf32>
    %c0_12 = arith.constant 0 : index
    %c0_13 = arith.constant 0 : index
    %18 = vector.load %arg6[%c0_12, %c0_13] : memref<2x1024xf32, #tpu.memory_space<vmem>>, vector<2x1024xf32>
    tpu.vector_store %arg6[%c0_12, %c0_13], %17 {strides = array<i32>} : memref<2x1024xf32, #tpu.memory_space<vmem>>, vector<2x1024xf32>,
    return
  }
  func.func @transform_0(%arg0: i32) -> (i32, i32) {
    %c0_i32 = arith.constant 0 : i32
    %c0_i32_0 = arith.constant 0 : i32
    return %arg0, %c0_i32 : i32, i32
  }
  func.func @transform_1(%arg0: i32) -> (i32, i32) {
    %c0_i32 = arith.constant 0 : i32
    %c0_i32_0 = arith.constant 0 : i32
    %c0_i32_1 = arith.constant 0 : i32
    return %c0_i32, %c0_i32_0 : i32, i32
  }
  func.func @transform_2(%arg0: i32) -> (i32, i32) {
    %c0_i32 = arith.constant 0 : i32
    %c0_i32_0 = arith.constant 0 : i32
    %c0_i32_1 = arith.constant 0 : i32
    return %c0_i32, %c0_i32_0 : i32, i32
  }
  func.func @transform_3(%arg0: i32) -> (i32, i32) {
    %c0_i32 = arith.constant 0 : i32
    %c0_i32_0 = arith.constant 0 : i32
    %c0_i32_1 = arith.constant 0 : i32
    return %c0_i32, %c0_i32_0 : i32, i32
  }
  func.func @transform_4(%arg0: i32) -> (i32, i32) {
    %c0_i32 = arith.constant 0 : i32
    %c0_i32_0 = arith.constant 0 : i32
    %c0_i32_1 = arith.constant 0 : i32
    return %c0_i32, %c0_i32_0 : i32, i32
  }
  func.func @transform_5(%arg0: i32) -> (i32, i32) {
    %c0_i32 = arith.constant 0 : i32
    %c0_i32_0 = arith.constant 0 : i32
    return %arg0, %c0_i32 : i32, i32
  }
}

</mosaic_0001>

<bundles_post_ra>
// kernel: tpu_custom_call.1
= control target key start
LH: loop header
LB: loop body
LE: loop exit
PB: predicated region body
PF: predicated region fallthrough
CT: control target
= control target key end

     0   :  { %10 = vsyncpa [#allocation3], 0  ;;  %s1091_s0 = inlined_call_operand.hbm [shape: f32[2,8], index: 0, kind: input, shape index: {}]   ;;  %s1092_s1 = inlined_call_operand.hbm [shape: f32[8,128], index: 1, kind: input, shape index: {}]   ;;  %s1093_s2 = inlined_call_operand.vmem [shape: f32[1,128], index: 2, kind: input, shape index: {}]   ;;  %s1094_s3 = inlined_call_operand.hbm [shape: f32[128,1024], index: 3, kind: input, shape index: {}]   ;;  %s1095_s4 = inlined_call_operand.vmem [shape: f32[1,1024], index: 4, kind: input, shape index: {}]   ;;  %s1096_s5 = inlined_call_operand.hbm [shape: f32[2,1024], index: 5, kind: output, shape index: {}]  }
   0x1   :  { %11 = vsyncpa [#allocation6], 0 }
   0x2   :  { %12 = vsyncpa [#allocation4], 0  ;;  %s986_s18 = smov [#allocation5]   ;;  %s987_s20 = smov [#allocation2]  }
   0x3   :  { %s29_s19 = sshll.u32 %s986_s18, 4  ;;  %s19_s21 = sshll.u32 %s987_s20, 4  ;;  %s30_s19 = int_to_ptr.vmem [resolvable:$true] %s29_s19  ;;  %s20_s21 = int_to_ptr.vmem [resolvable:$true] %s19_s21 }
   0x4   :  { %s892_s24 = scalar_lea.hbm %s1092_s1, 128 }
   0x5   :  { %p893_p0 = scmp.ne.s32.totalorder %s1092_s1, %s892_s24  ;;  %p896_p1 = scmp.lt.u32.totalorder %s892_s24, %s1092_s1 }
   0x7   :  { %p898_p2 = pnand %p896_p1, %p893_p0 }
   0x9   :  { %901 = shalt.err (!%p898_p2)
}
   0xa   :  { %s902_s29 = scalar_lea.vmem %s30_s19, 128  ;;  %p907_p4 = scmp.lt.s32.totalorder %s30_s19, %s30_s19 }
   0xb   :  { %p903_p3 = scmp.ne.s32.totalorder %s30_s19, %s902_s29  ;;  %p908_p5 = scmp.lt.s32.totalorder %s902_s29, %s902_s29 }
   0xd   :  { %p909_p6 = por %p908_p5, %p907_p4 }
   0xf   :  { %p910_p7 = pnand %p909_p6, %p903_p3 }
  0x11   :  { %913 = shalt.err (!%p910_p7)
}
  0x12   :  { %32 = dma.hbm_to_vmem [thread:$0]  %s1092_s1, 128, %s30_s19, [#allocation6]  }
  0x13   :  { %s914_s9 = scalar_lea.hbm %s1091_s0, 32 }
  0x14   :  { %p915_p8 = scmp.ne.s32.totalorder %s1091_s0, %s914_s9  ;;  %p918_p9 = scmp.lt.u32.totalorder %s914_s9, %s1091_s0 }
  0x16   :  { %p920_p10 = pnand %p918_p9, %p915_p8 }
  0x18   :  { %923 = shalt.err (!%p920_p10)
}
  0x19   :  { %s924_s14 = scalar_lea.vmem %s20_s21, 32  ;;  %p929_p12 = scmp.lt.s32.totalorder %s20_s21, %s20_s21 }
  0x1a   :  { %p925_p11 = scmp.ne.s32.totalorder %s20_s21, %s924_s14  ;;  %p930_p13 = scmp.lt.s32.totalorder %s924_s14, %s924_s14 }
  0x1c   :  { %p931_p0 = por %p930_p13, %p929_p12 }
  0x1e   :  { %p932_p1 = pnand %p931_p0, %p925_p11 }
  0x20   :  { %935 = shalt.err (!%p932_p1)
}
  0x21   :  { %22 = dma.hbm_to_vmem [thread:$0]  %s1091_s0, 32, %s20_s21, [#allocation3]  }
  0x22   :  { %s988_s16 = smov [#allocation7]   ;;  %s936_s20 = scalar_lea.hbm %s1094_s3, 16384 }
  0x23   :  { %s40_s17 = sshll.u32 %s988_s16, 4  ;;  %p937_p2 = scmp.ne.s32.totalorder %s1094_s3, %s936_s20  ;;  %s41_s17 = int_to_ptr.vmem [resolvable:$true] %s40_s17 }
  0x24   :  { %p940_p3 = scmp.lt.u32.totalorder %s936_s20, %s1094_s3 }
  0x26   :  { %p942_p4 = pnand %p940_p3, %p937_p2 }
  0x28   :  { %945 = shalt.err (!%p942_p4)
}
  0x29   :  { %s946_s26 = scalar_lea.vmem %s41_s17, 16384  ;;  %p951_p6 = scmp.lt.s32.totalorder %s41_s17, %s41_s17 }
  0x2a   :  { %p947_p5 = scmp.ne.s32.totalorder %s41_s17, %s946_s26  ;;  %p952_p7 = scmp.lt.s32.totalorder %s946_s26, %s946_s26 }
  0x2c   :  { %p953_p8 = por %p952_p7, %p951_p6 }
  0x2e   :  { %p954_p9 = pnand %p953_p8, %p947_p5 }
  0x30   :  { %957 = shalt.err (!%p954_p9)
}
  0x31   :  { %s989_s0 = smov 1024   ;;  %s990_s21 = smov 64  }
  0x32   :  { %46 = dma.hbm_to_vmem [thread:$0]  %s1094_s3, 16384, %s41_s17, [#allocation6], %s989_s0, %s989_s0, %s990_s21  }
  0x33   :  { %980 = dma.done.wait [#allocation3], 32  }
  0x34   :  { %981 = vsyncadd [#allocation3], 4294967264 }
  0x35   :  { %982 = dma.done.wait [#allocation6], 16512  }
  0x36   :  { %983 = vsyncadd [#allocation6], 4294950784  ;;  %v991_v0 = vmov 0.0   ;;  %vm992_vm0 = vmmov 0   ;;  %vm67_vm1 = vcmask 64512   ;;  %v59_v1 = vld [vmem:[#allocation5] sm:$0xff] }
  0x37   :  { %718 = vmatprep.subr.mxu0 %v991_v0  ;;  %720 = vmatprep.mubr.msk.f32.mxu0 %vm992_vm0, %v991_v0  ;;  %v58_v2 = vld [vmem:[#allocation2] sm:$0x3]  ;;  %v143_v3 = vld [vmem:[#allocation7 + $0x8] sm:$0xff]  ;;  %v145_v5 = vld [vmem:[#allocation7 + $0x18] sm:$0xff] }
  0x38   :  { %376 = vmatprep.mubr.f32.mxu1 %v991_v0  ;;  %719 = vmatpush3.msra.mxu0 %v59_v1  ;;  %v151_v4 = vld [vmem:[#allocation7 + $0x48] sm:$0xff]  ;;  %v153_v6 = vld [vmem:[#allocation7 + $0x58] sm:$0xff]  ;;  %v142_v9 = vld [vmem:[#allocation7] sm:$0xff] }
  0x39   :  { %721 = vmatmul.mubr.msk.f32.vlgmr.msra.gmra.mrb[0].mxu0 %vm67_vm1, %v58_v2  ;;  %v723_v7 = vpack.c.bf16 %v151_v4, %v143_v3  ;;  %v755_v8 = vpack.c.bf16 %v153_v6, %v145_v5  ;;  %v150_v10 = vld [vmem:[#allocation7 + $0x40] sm:$0xff]  ;;  %v144_v11 = vld [vmem:[#allocation7 + $0x10] sm:$0xff]  ;;  %v159_v14 = vld [vmem:[#allocation7 + $0x88] sm:$0xff] }
  0x3a   :  { %v725_v12 = vpack.c.bf16 %v150_v10, %v142_v9  ;;  %v152_v13 = vld [vmem:[#allocation7 + $0x50] sm:$0xff]  ;;  %v167_v15 = vld [vmem:[#allocation7 + $0xc8] sm:$0xff]  ;;  %447 = vmatprep.mubr.f32.mxu0 %v991_v0  ;;  %v161_v18 = vld [vmem:[#allocation7 + $0x98] sm:$0xff] }
  0x3b   :  { %724 = vmatprep.subr.bf16.mxu1 %v723_v7  ;;  %756 = vmatprep.subr.bf16.mxu0 %v755_v8  ;;  %v757_v16 = vpack.c.bf16 %v152_v13, %v144_v11  ;;  %v727_v17 = vpack.c.bf16 %v167_v15, %v159_v14  ;;  %v169_v19 = vld [vmem:[#allocation7 + $0xd8] sm:$0xff]  ;;  %v158_v20 = vld [vmem:[#allocation7 + $0x80] sm:$0xff]  ;;  %v160_v23 = vld [vmem:[#allocation7 + $0x90] sm:$0xff] }
  0x3c   :  { %726 = vmatpush1.bf16.msra.mxu1 %v725_v12  ;;  %v759_v21 = vpack.c.bf16 %v169_v19, %v161_v18  ;;  %v166_v22 = vld [vmem:[#allocation7 + $0xc0] sm:$0xff]  ;;  %v168_v24 = vld [vmem:[#allocation7 + $0xd0] sm:$0xff]  ;;  %v175_v27 = vld [vmem:[#allocation7 + $0x108] sm:$0xff] }
  0x3d   :  { %758 = vmatpush1.bf16.msra.mxu0 %v757_v16  ;;  %728 = vmatprep.subr.bf16.mxu1 %v727_v17  ;;  %v729_v25 = vpack.c.bf16 %v166_v22, %v158_v20  ;;  %v761_v26 = vpack.c.bf16 %v168_v24, %v160_v23  ;;  %v183_v28 = vld [vmem:[#allocation7 + $0x148] sm:$0xff]  ;;  %v177_v29 = vld [vmem:[#allocation7 + $0x118] sm:$0xff]  ;;  %v174_v32 = vld [vmem:[#allocation7 + $0x100] sm:$0xff] }
  0x3e   :  { %760 = vmatprep.subr.bf16.mxu0 %v759_v21  ;;  %v731_v30 = vpack.c.bf16 %v183_v28, %v175_v27  ;;  %v185_v31 = vld [vmem:[#allocation7 + $0x158] sm:$0xff]  ;;  %v182_v33 = vld [vmem:[#allocation7 + $0x140] sm:$0xff]  ;;  %v176_v35 = vld [vmem:[#allocation7 + $0x110] sm:$0xff] }
  0x3f   :  { %v763_v34 = vpack.c.bf16 %v185_v31, %v177_v29  ;;  %v184_v36 = vld [vmem:[#allocation7 + $0x150] sm:$0xff]  ;;  %v191_v37 = vld [vmem:[#allocation7 + $0x188] sm:$0xff]  ;;  %v733_v38 = vpack.c.bf16 %v182_v33, %v174_v32  ;;  %v193_v40 = vld [vmem:[#allocation7 + $0x198] sm:$0xff] }
  0x40   :  { %730 = vmatpush1.bf16.msra.mxu1 %v729_v25  ;;  %v199_v39 = vld [vmem:[#allocation7 + $0x1c8] sm:$0xff]  ;;  %v201_v41 = vld [vmem:[#allocation7 + $0x1d8] sm:$0xff]  ;;  %v765_v42 = vpack.c.bf16 %v184_v36, %v176_v35  ;;  %v190_v44 = vld [vmem:[#allocation7 + $0x180] sm:$0xff] }
  0x41   :  { %762 = vmatpush1.bf16.msra.mxu0 %v761_v26  ;;  %732 = vmatprep.subr.bf16.mxu1 %v731_v30  ;;  %v735_v43 = vpack.c.bf16 %v199_v39, %v191_v37  ;;  %v198_v45 = vld [vmem:[#allocation7 + $0x1c0] sm:$0xff]  ;;  %v192_v46 = vld [vmem:[#allocation7 + $0x190] sm:$0xff]  ;;  %v767_v47 = vpack.c.bf16 %v201_v41, %v193_v40  ;;  %v207_v49 = vld [vmem:[#allocation7 + $0x208] sm:$0xff] }
  0x42   :  { %764 = vmatprep.subr.bf16.mxu0 %v763_v34  ;;  %v200_v48 = vld [vmem:[#allocation7 + $0x1d0] sm:$0xff]  ;;  %v215_v50 = vld [vmem:[#allocation7 + $0x248] sm:$0xff]  ;;  %v209_v51 = vld [vmem:[#allocation7 + $0x218] sm:$0xff]  ;;  %v737_v53 = vpack.c.bf16 %v198_v45, %v190_v44 }
  0x43   :  { %v217_v52 = vld [vmem:[#allocation7 + $0x258] sm:$0xff]  ;;  %v769_v54 = vpack.c.bf16 %v200_v48, %v192_v46  ;;  %v739_v55 = vpack.c.bf16 %v215_v50, %v207_v49  ;;  %v206_v56 = vld [vmem:[#allocation7 + $0x200] sm:$0xff]  ;;  %v208_v58 = vld [vmem:[#allocation7 + $0x210] sm:$0xff] }
  0x44   :  { %734 = vmatpush1.bf16.msra.mxu1 %v733_v38  ;;  %v214_v57 = vld [vmem:[#allocation7 + $0x240] sm:$0xff]  ;;  %v771_v59 = vpack.c.bf16 %v217_v52, %v209_v51  ;;  %v216_v60 = vld [vmem:[#allocation7 + $0x250] sm:$0xff]  ;;  %v223_v61 = vld [vmem:[#allocation7 + $0x288] sm:$0xff] }
  0x45   :  { %766 = vmatpush1.bf16.msra.mxu0 %v765_v42  ;;  %736 = vmatprep.subr.bf16.mxu1 %v735_v43  ;;  %v231_v62 = vld [vmem:[#allocation7 + $0x2c8] sm:$0xff]  ;;  %v225_v63 = vld [vmem:[#allocation7 + $0x298] sm:$0xff]  ;;  %v741_v2 = vpack.c.bf16 %v214_v57, %v206_v56  ;;  %v773_v3 = vpack.c.bf16 %v216_v60, %v208_v58  ;;  %v222_v5 = vld [vmem:[#allocation7 + $0x280] sm:$0xff] }
  0x46   :  { %768 = vmatprep.subr.bf16.mxu0 %v767_v47  ;;  %v233_v1 = vld [vmem:[#allocation7 + $0x2d8] sm:$0xff]  ;;  %v743_v4 = vpack.c.bf16 %v231_v62, %v223_v61  ;;  %v230_v6 = vld [vmem:[#allocation7 + $0x2c0] sm:$0xff]  ;;  %v224_v7 = vld [vmem:[#allocation7 + $0x290] sm:$0xff] }
  0x47   :  { %v775_v8 = vpack.c.bf16 %v233_v1, %v225_v63  ;;  %v232_v9 = vld [vmem:[#allocation7 + $0x2d0] sm:$0xff]  ;;  %v239_v10 = vld [vmem:[#allocation7 + $0x308] sm:$0xff]  ;;  %v241_v12 = vld [vmem:[#allocation7 + $0x318] sm:$0xff]  ;;  %v745_v14 = vpack.c.bf16 %v230_v6, %v222_v5 }
  0x48   :  { %738 = vmatpush1.bf16.msra.mxu1 %v737_v53  ;;  %v247_v11 = vld [vmem:[#allocation7 + $0x348] sm:$0xff]  ;;  %v249_v13 = vld [vmem:[#allocation7 + $0x358] sm:$0xff]  ;;  %v777_v15 = vpack.c.bf16 %v232_v9, %v224_v7  ;;  %v238_v17 = vld [vmem:[#allocation7 + $0x300] sm:$0xff] }
  0x49   :  { %770 = vmatpush1.bf16.msra.mxu0 %v769_v54  ;;  %740 = vmatprep.subr.bf16.mxu1 %v739_v55  ;;  %v747_v16 = vpack.c.bf16 %v247_v11, %v239_v10  ;;  %v246_v18 = vld [vmem:[#allocation7 + $0x340] sm:$0xff]  ;;  %v779_v19 = vpack.c.bf16 %v249_v13, %v241_v12  ;;  %v240_v20 = vld [vmem:[#allocation7 + $0x310] sm:$0xff]  ;;  %v255_v24 = vld [vmem:[#allocation7 + $0x388] sm:$0xff] }
  0x4a   :  { %772 = vmatprep.subr.bf16.mxu0 %v771_v59  ;;  %v248_v21 = vld [vmem:[#allocation7 + $0x350] sm:$0xff]  ;;  %v749_v22 = vpack.c.bf16 %v246_v18, %v238_v17  ;;  %v263_v25 = vld [vmem:[#allocation7 + $0x3c8] sm:$0xff]  ;;  %v257_v26 = vld [vmem:[#allocation7 + $0x398] sm:$0xff] }
  0x4b   :  { %v781_v23 = vpack.c.bf16 %v248_v21, %v240_v20  ;;  %v751_v27 = vpack.c.bf16 %v263_v25, %v255_v24  ;;  %v265_v28 = vld [vmem:[#allocation7 + $0x3d8] sm:$0xff]  ;;  %v254_v29 = vld [vmem:[#allocation7 + $0x380] sm:$0xff]  ;;  %v256_v33 = vld [vmem:[#allocation7 + $0x390] sm:$0xff] }
  0x4c   :  { %742 = vmatpush1.bf16.msra.mxu1 %v741_v2  ;;  %v262_v30 = vld [vmem:[#allocation7 + $0x3c0] sm:$0xff]  ;;  %v783_v31 = vpack.c.bf16 %v265_v28, %v257_v26  ;;  %v264_v34 = vld [vmem:[#allocation7 + $0x3d0] sm:$0xff]  ;;  %v147_v36 = vld [vmem:[#allocation7 + $0x28] sm:$0xff] }
  0x4d   :  { %774 = vmatpush1.bf16.msra.mxu0 %v773_v3  ;;  %744 = vmatprep.subr.bf16.mxu1 %v743_v4  ;;  %v753_v32 = vpack.c.bf16 %v262_v30, %v254_v29  ;;  %v785_v35 = vpack.c.bf16 %v264_v34, %v256_v33  ;;  %v155_v37 = vld [vmem:[#allocation7 + $0x68] sm:$0xff]  ;;  %v149_v38 = vld [vmem:[#allocation7 + $0x38] sm:$0xff]  ;;  %v146_v43 = vld [vmem:[#allocation7 + $0x20] sm:$0xff] }
  0x4e   :  { %776 = vmatprep.subr.bf16.mxu0 %v775_v8  ;;  %v787_v39 = vpack.c.bf16 %v155_v37, %v147_v36  ;;  %v157_v40 = vld [vmem:[#allocation7 + $0x78] sm:$0xff]  ;;  %v706_v42 = vld [vmem:[%s1093_s2] ss:$0 sm:$0xff]  ;;  %v154_v44 = vld [vmem:[#allocation7 + $0x60] sm:$0xff] }
  0x4f   :  { %v819_v41 = vpack.c.bf16 %v157_v40, %v149_v38  ;;  %v148_v45 = vld [vmem:[#allocation7 + $0x30] sm:$0xff]  ;;  %v163_v47 = vld [vmem:[#allocation7 + $0xa8] sm:$0xff]  ;;  %v165_v50 = vld [vmem:[#allocation7 + $0xb8] sm:$0xff]  ;;  %v789_v54 = vpack.c.bf16 %v154_v44, %v146_v43 }
  0x50   :  { %746 = vmatpush1.bf16.msra.mxu1 %v745_v14  ;;  %v156_v46 = vld [vmem:[#allocation7 + $0x70] sm:$0xff]  ;;  %v171_v49 = vld [vmem:[#allocation7 + $0xe8] sm:$0xff]  ;;  %v173_v51 = vld [vmem:[#allocation7 + $0xf8] sm:$0xff] }
  0x51   :  { %778 = vmatpush1.bf16.msra.mxu0 %v777_v15  ;;  %748 = vmatprep.subr.bf16.mxu1 %v747_v16  ;;  %v821_v55 = vpack.c.bf16 %v156_v46, %v148_v45  ;;  %v162_v56 = vld [vmem:[#allocation7 + $0xa0] sm:$0xff]  ;;  %v791_v59 = vpack.c.bf16 %v171_v49, %v163_v47  ;;  %v823_v60 = vpack.c.bf16 %v173_v51, %v165_v50  ;;  %v164_v61 = vld [vmem:[#allocation7 + $0xb0] sm:$0xff]  ;;  %v179_v63 = vld [vmem:[#allocation7 + $0x128] sm:$0xff] }
  0x52   :  { %780 = vmatprep.subr.bf16.mxu0 %v779_v19  ;;  %v170_v57 = vld [vmem:[#allocation7 + $0xe0] sm:$0xff]  ;;  %v172_v62 = vld [vmem:[#allocation7 + $0xf0] sm:$0xff]  ;;  %v187_v1 = vld [vmem:[#allocation7 + $0x168] sm:$0xff] }
  0x53   :  { %v181_v2 = vld [vmem:[#allocation7 + $0x138] sm:$0xff]  ;;  %v793_v4 = vpack.c.bf16 %v170_v57, %v162_v56  ;;  %v825_v5 = vpack.c.bf16 %v172_v62, %v164_v61  ;;  %v178_v6 = vld [vmem:[#allocation7 + $0x120] sm:$0xff]  ;;  %v795_v8 = vpack.c.bf16 %v187_v1, %v179_v63  ;;  %v180_v10 = vld [vmem:[#allocation7 + $0x130] sm:$0xff] }
  0x54   :  { %750 = vmatpush1.bf16.msra.mxu1 %v749_v22  ;;  %v189_v3 = vld [vmem:[#allocation7 + $0x178] sm:$0xff]  ;;  %v186_v7 = vld [vmem:[#allocation7 + $0x160] sm:$0xff]  ;;  %v188_v11 = vld [vmem:[#allocation7 + $0x170] sm:$0xff] }
  0x55   :  { %782 = vmatpush1.bf16.msra.mxu0 %v781_v23  ;;  %752 = vmatprep.subr.bf16.mxu1 %v751_v27  ;;  %v827_v9 = vpack.c.bf16 %v189_v3, %v181_v2  ;;  %v195_v12 = vld [vmem:[#allocation7 + $0x1a8] sm:$0xff]  ;;  %v197_v14 = vld [vmem:[#allocation7 + $0x1b8] sm:$0xff]  ;;  %v797_v16 = vpack.c.bf16 %v186_v7, %v178_v6  ;;  %v829_v17 = vpack.c.bf16 %v188_v11, %v180_v10  ;;  %v194_v18 = vld [vmem:[#allocation7 + $0x1a0] sm:$0xff]  ;;  %v272_v11 = vlaneseq }
  0x56   :  { %784 = vmatprep.subr.bf16.mxu0 %v783_v31  ;;  %v203_v13 = vld [vmem:[#allocation7 + $0x1e8] sm:$0xff]  ;;  %v205_v15 = vld [vmem:[#allocation7 + $0x1f8] sm:$0xff]  ;;  %v202_v19 = vld [vmem:[#allocation7 + $0x1e0] sm:$0xff] }
  0x57   :  { %v799_v20 = vpack.c.bf16 %v203_v13, %v195_v12  ;;  %v831_v21 = vpack.c.bf16 %v205_v15, %v197_v14  ;;  %v196_v22 = vld [vmem:[#allocation7 + $0x1b0] sm:$0xff]  ;;  %v211_v24 = vld [vmem:[#allocation7 + $0x228] sm:$0xff]  ;;  %v213_v26 = vld [vmem:[#allocation7 + $0x238] sm:$0xff]  ;;  %v801_v28 = vpack.c.bf16 %v202_v19, %v194_v18  ;;  %v273_v12 = vshrl.u32 %v272_v11, 7 }
  0x58   :  { %754 = vmatpush1.bf16.msra.mxu1 %v753_v32  ;;  %v204_v23 = vld [vmem:[#allocation7 + $0x1f0] sm:$0xff]  ;;  %v219_v25 = vld [vmem:[#allocation7 + $0x268] sm:$0xff]  ;;  %v221_v27 = vld [vmem:[#allocation7 + $0x278] sm:$0xff] }
  0x59   :  { %786 = vmatpush1.bf16.msra.mxu0 %v785_v35  ;;  %788 = vmatprep.subr.bf16.mxu1 %v787_v39  ;;  %v210_v29 = vld [vmem:[#allocation7 + $0x220] sm:$0xff]  ;;  %v803_v31 = vpack.c.bf16 %v219_v25, %v211_v24  ;;  %v835_v32 = vpack.c.bf16 %v221_v27, %v213_v26  ;;  %v212_v33 = vld [vmem:[#allocation7 + $0x230] sm:$0xff]  ;;  %v227_v35 = vld [vmem:[#allocation7 + $0x2a8] sm:$0xff]  ;;  %v274_v13 = vsub.s32 0, %v273_v12  ;;  %v282_v14 = vsub.s32 2, %v273_v12 }
  0x5a   :  { %820 = vmatprep.subr.bf16.mxu0 %v819_v41  ;;  %v218_v30 = vld [vmem:[#allocation7 + $0x260] sm:$0xff]  ;;  %v220_v34 = vld [vmem:[#allocation7 + $0x270] sm:$0xff]  ;;  %v235_v36 = vld [vmem:[#allocation7 + $0x2e8] sm:$0xff] }
  0x5b   :  { %v229_v37 = vld [vmem:[#allocation7 + $0x2b8] sm:$0xff]  ;;  %v805_v39 = vpack.c.bf16 %v218_v30, %v210_v29  ;;  %v837_v40 = vpack.c.bf16 %v220_v34, %v212_v33  ;;  %v226_v41 = vld [vmem:[#allocation7 + $0x2a0] sm:$0xff]  ;;  %v807_v43 = vpack.c.bf16 %v235_v36, %v227_v35  ;;  %v228_v45 = vld [vmem:[#allocation7 + $0x2b0] sm:$0xff] }
  0x5c   :  { %v237_v38 = vld [vmem:[#allocation7 + $0x2f8] sm:$0xff]  ;;  %v236_v46 = vld [vmem:[#allocation7 + $0x2f0] sm:$0xff]  ;;  %v243_v47 = vld [vmem:[#allocation7 + $0x328] sm:$0xff] }
  0x5d   :  { %v839_v44 = vpack.c.bf16 %v237_v38, %v229_v37  ;;  %v245_v49 = vld [vmem:[#allocation7 + $0x338] sm:$0xff]  ;;  %v244_v57 = vld [vmem:[#allocation7 + $0x330] sm:$0xff]  ;;  %v267_v61 = vld [vmem:[#allocation7 + $0x3e8] sm:$0xff] }
  0x5e   :  { %v253_v50 = vld [vmem:[#allocation7 + $0x378] sm:$0xff]  ;;  %v258_v3 = vld [vmem:[#allocation7 + $0x3a0] sm:$0xff]  ;;  %v260_v7 = vld [vmem:[#allocation7 + $0x3b0] sm:$0xff] }
  0x5f   :  { %v843_v56 = vpack.c.bf16 %v253_v50, %v245_v49  ;;  %v261_v62 = vld [vmem:[#allocation7 + $0x3b8] sm:$0xff]  ;;  %v266_v6 = vld [vmem:[#allocation7 + $0x3e0] sm:$0xff]  ;;  %v270_v15 = vld [vmem:[%s1095_s4] sm:$0xff]  ;;  %s994_s4 = smov [#allocation8]  }
  0x60   :  { %v269_v63 = vld [vmem:[#allocation7 + $0x3f8] sm:$0xff]  ;;  %v275_v18 = vrot.slane %v270_v15, %v274_v13  ;;  %v283_v19 = vrot.slane %v270_v15, %v282_v14  ;;  %s696_s6 = sshll.u32 %s994_s4, 4  ;;  %s697_s6 = int_to_ptr.vmem [resolvable:$true] %s696_s6 }
  0x61   :  { %s958_s7 = scalar_lea.vmem %s697_s6, 256  ;;  %p963_p11 = scmp.lt.s32.totalorder %s697_s6, %s697_s6 }
  0x62   :  { %p959_p10 = scmp.ne.s32.totalorder %s697_s6, %s958_s7  ;;  %p964_p12 = scmp.lt.s32.totalorder %s958_s7, %s958_s7 }
  0x64   :  { %p965_p13 = por %p964_p12, %p963_p11 }
  0x66   :  { %p966_p0 = pnand %p965_p13, %p959_p10 }
 0x10c   :  { %v137_v48 = vpop.f32.mrb[0].mxu0 }
 0x10d   :  { %v138_v52 = vadd.f32 %v706_v42, %v137_v48  ;;  %v722_v53 = vpop.f32.mrb[1].mxu0  ;;  %v234_v42 = vld [vmem:[#allocation7 + $0x2e0] sm:$0xff]  ;;  %v251_v48 = vld [vmem:[#allocation7 + $0x368] sm:$0xff] }
 0x10e   :  { %v809_v51 = vpack.c.bf16 %v234_v42, %v226_v41  ;;  %v242_v53 = vld [vmem:[#allocation7 + $0x320] sm:$0xff]  ;;  %v290_v42 = vsub.s32 4, %v273_v12 }
 0x10f   :  { %v1068_v58 = vmax.f32 %v138_v52, 0.0  ;;  %v841_v52 = vpack.c.bf16 %v236_v46, %v228_v45  ;;  %v294_v45 = vsub.s32 5, %v273_v12  ;;  %v302_v46 = vsub.s32 7, %v273_v12 }
 0x110   :  { %v291_v49 = vrot.slane %v270_v15, %v290_v42 }
 0x111   :  { %377 = vmatmul.mubr.f32.vlgmr.msra.gmra.mrb[0].mxu1 %v1068_v58  ;;  %448 = vmatmul.mubr.f32.vlgmr.msra.gmra.mrb[2].mxu0 %v1068_v58 }
 0x112   :  { %790 = vmatpush1.bf16.msra.mxu1 %v789_v54  ;;  %822 = vmatpush1.bf16.msra.mxu0 %v821_v55  ;;  %v250_v54 = vld [vmem:[#allocation7 + $0x360] sm:$0xff]  ;;  %v811_v55 = vpack.c.bf16 %v251_v48, %v243_v47 }
 0x113   :  { %792 = vmatprep.subr.bf16.mxu1 %v791_v59  ;;  %824 = vmatprep.subr.bf16.mxu0 %v823_v60  ;;  %v252_v59 = vld [vmem:[#allocation7 + $0x370] sm:$0xff]  ;;  %v259_v60 = vld [vmem:[#allocation7 + $0x3a8] sm:$0xff]  ;;  %v813_v1 = vpack.c.bf16 %v250_v54, %v242_v53  ;;  %v295_v53 = vrot.slane %v270_v15, %v294_v45  ;;  %v303_v54 = vrot.slane %v270_v15, %v302_v46 }
 0x114   :  { %518 = vmatprep.mubr.f32.mxu1 %v991_v0  ;;  %589 = vmatprep.mubr.f32.mxu0 %v991_v0  ;;  %v833_v0 = vpack.c.bf16 %v204_v23, %v196_v22  ;;  %v845_v2 = vpack.c.bf16 %v252_v59, %v244_v57 }
 0x116   :  { %794 = vmatpush1.bf16.msra.mxu1 %v793_v4  ;;  %826 = vmatpush1.bf16.msra.mxu0 %v825_v5  ;;  %v815_v4 = vpack.c.bf16 %v267_v61, %v259_v60  ;;  %v847_v5 = vpack.c.bf16 %v269_v63, %v261_v62 }
 0x117   :  { %796 = vmatprep.subr.bf16.mxu1 %v795_v8  ;;  %828 = vmatprep.subr.bf16.mxu0 %v827_v9  ;;  %v268_v8 = vld [vmem:[#allocation7 + $0x3f0] sm:$0xff]  ;;  %v817_v9 = vpack.c.bf16 %v266_v6, %v258_v3 }
 0x118   :  { %v849_v10 = vpack.c.bf16 %v268_v8, %v260_v7 }
 0x11a   :  { %798 = vmatpush1.bf16.msra.mxu1 %v797_v16  ;;  %830 = vmatpush1.bf16.msra.mxu0 %v829_v17  ;;  %v278_v16 = vsub.s32 1, %v273_v12  ;;  %v286_v17 = vsub.s32 3, %v273_v12 }
 0x11b   :  { %800 = vmatprep.subr.bf16.mxu1 %v799_v20  ;;  %832 = vmatprep.subr.bf16.mxu0 %v831_v21 }
 0x11c   :  { %v279_v20 = vrot.slane %v270_v15, %v278_v16  ;;  %v287_v21 = vrot.slane %v270_v15, %v286_v17 }
 0x11e   :  { %802 = vmatpush1.bf16.msra.mxu1 %v801_v28  ;;  %834 = vmatpush1.bf16.msra.mxu0 %v833_v0 }
 0x11f   :  { %804 = vmatprep.subr.bf16.mxu1 %v803_v31  ;;  %836 = vmatprep.subr.bf16.mxu0 %v835_v32 }
 0x122   :  { %806 = vmatpush1.bf16.msra.mxu1 %v805_v39  ;;  %838 = vmatpush1.bf16.msra.mxu0 %v837_v40  ;;  %v993_v40 = vmov 1983009808  }
 0x123   :  { %808 = vmatprep.subr.bf16.mxu1 %v807_v43  ;;  %840 = vmatprep.subr.bf16.mxu0 %v839_v44  ;;  %v655_v41 = vunpack.c.l.s4 %v993_v40  ;;  %v298_v43 = vsub.s32 6, %v273_v12 }
 0x125   :  { %v656_v44 = vunpack.c.0.s8 %v655_v41  ;;  %v299_v50 = vrot.slane %v270_v15, %v298_v43 }
 0x126   :  { %810 = vmatpush1.bf16.msra.mxu1 %v809_v51  ;;  %842 = vmatpush1.bf16.msra.mxu0 %v841_v52 }
 0x127   :  { %812 = vmatprep.subr.bf16.mxu1 %v811_v55  ;;  %844 = vmatprep.subr.bf16.mxu0 %v843_v56  ;;  %v659_v51 = vsub.s32 %v656_v44, %v273_v12 }
 0x12a   :  { %814 = vmatpush1.bf16.msra.mxu1 %v813_v1  ;;  %846 = vmatpush1.bf16.msra.mxu0 %v845_v2 }
 0x12b   :  { %816 = vmatprep.subr.bf16.mxu1 %v815_v4  ;;  %848 = vmatprep.subr.bf16.mxu0 %v847_v5 }
 0x12e   :  { %818 = vmatpush1.bf16.msra.mxu1 %v817_v9  ;;  %850 = vmatpush1.bf16.msra.mxu0 %v849_v10 }
 0x131   :  { %519 = vmatmul.mubr.f32.vlgmr.msra.gmra.mrb[2].mxu1 %v1068_v58  ;;  %590 = vmatmul.mubr.f32.vlgmr.msra.gmra.mrb[4].mxu0 %v1068_v58 }
 0x1e4   :  { %v378_v22 = vpop.f32.mrb[0].mxu1  ;;  %v449_v23 = vpop.f32.mrb[2].mxu0 }
 0x1e5   :  { %v379_v24 = vadd.f32 %v378_v22, %v275_v18  ;;  %v450_v25 = vadd.f32 %v449_v23, %v283_v19  ;;  %v380_v26 = vpop.f32.mrb[1].mxu1  ;;  %v451_v58 = vpop.f32.mrb[3].mxu0 }
 0x1e6   :  { %v381_v27 = vadd.f32 %v380_v26, %v279_v20  ;;  %v452_v28 = vadd.f32 %v451_v58, %v287_v21 }
 0x1e7   :  { %v708_v0 = vmul.f32 -1.442695, %v379_v24  ;;  %v710_v29 = vmul.f32 -1.442695, %v450_v25 }
 0x1e8   :  { %v709_v30 = vmul.f32 -1.442695, %v381_v27  ;;  %v711_v31 = vmul.f32 -1.442695, %v452_v28 }
 0x1e9   :  { %860 = vpow2.f32 %v708_v0 }
 0x1ea   :  { %862 = vpow2.f32 %v710_v29 }
 0x1eb   :  { %864 = vpow2.f32 %v709_v30 }
 0x1ec   :  { %866 = vpow2.f32 %v711_v31 }
 0x1f3   :  { %v861_v32 = vpop.eup %860 }
 0x1f4   :  { %v863_v33 = vpop.eup %862  ;;  %v620_v34 = vadd.f32 1.0, %v861_v32 }
 0x1f5   :  { %v865_v35 = vpop.eup %864  ;;  %v622_v36 = vadd.f32 1.0, %v863_v33 }
 0x1f6   :  { %v867_v37 = vpop.eup %866  ;;  %868 = vrcp.f32 %v620_v34  ;;  %v621_v38 = vadd.f32 1.0, %v865_v35 }
 0x1f7   :  { %870 = vrcp.f32 %v622_v36  ;;  %v623_v39 = vadd.f32 1.0, %v867_v37 }
 0x1f8   :  { %872 = vrcp.f32 %v621_v38 }
 0x1f9   :  { %874 = vrcp.f32 %v623_v39 }
 0x200   :  { %v869_v47 = vpop.eup %868 }
 0x201   :  { %v871_v48 = vpop.eup %870 }
 0x202   :  { %v873_v52 = vpop.eup %872 }
 0x203   :  { %v875_v55 = vpop.eup %874  ;;  %v652_v56 = vcombine.low %v869_v47, %v873_v52 }
 0x204   :  { %v520_v57 = vpop.f32.mrb[2].mxu1  ;;  %v591_v59 = vpop.f32.mrb[4].mxu0  ;;  %v653_v60 = vcombine.low %v871_v48, %v875_v55 }
 0x205   :  { %v521_v61 = vadd.f32 %v520_v57, %v291_v49  ;;  %v592_v62 = vadd.f32 %v591_v59, %v299_v50  ;;  %v522_v63 = vpop.f32.mrb[3].mxu1  ;;  %v593_v1 = vpop.f32.mrb[5].mxu0  ;;  %v660_v2 = vrot.slane %v652_v56, %v659_v51 }
 0x206   :  { %v523_v3 = vadd.f32 %v522_v63, %v295_v53  ;;  %v594_v4 = vadd.f32 %v593_v1, %v303_v54  ;;  %v667_v5 = vrot.slane %v653_v60, %v659_v51 }
 0x207   :  { %v712_v6 = vmul.f32 -1.442695, %v521_v61  ;;  %v714_v7 = vmul.f32 -1.442695, %v592_v62 }
 0x208   :  { %v713_v8 = vmul.f32 -1.442695, %v523_v3  ;;  %v715_v9 = vmul.f32 -1.442695, %v594_v4  ;;  %v668_v10 = vcombine.low %v660_v2, %v667_v5 }
 0x209   :  { %876 = vpow2.f32 %v712_v6 }
 0x20a   :  { %878 = vpow2.f32 %v714_v7  ;;  %688 = vst [vmem:[#allocation8] sm:$0xff] %v668_v10 }
 0x20b   :  { %880 = vpow2.f32 %v713_v8 }
 0x20c   :  { %882 = vpow2.f32 %v715_v9 }
 0x213   :  { %v877_v11 = vpop.eup %876 }
 0x214   :  { %v879_v12 = vpop.eup %878  ;;  %v624_v13 = vadd.f32 1.0, %v877_v11 }
 0x215   :  { %v881_v14 = vpop.eup %880  ;;  %v626_v15 = vadd.f32 1.0, %v879_v12 }
 0x216   :  { %v883_v16 = vpop.eup %882  ;;  %884 = vrcp.f32 %v624_v13  ;;  %v625_v17 = vadd.f32 1.0, %v881_v14 }
 0x217   :  { %886 = vrcp.f32 %v626_v15  ;;  %v627_v18 = vadd.f32 1.0, %v883_v16 }
 0x218   :  { %888 = vrcp.f32 %v625_v17 }
 0x219   :  { %890 = vrcp.f32 %v627_v18 }
 0x220   :  { %v885_v19 = vpop.eup %884 }
 0x221   :  { %v887_v20 = vpop.eup %886 }
 0x222   :  { %v889_v21 = vpop.eup %888 }
 0x223   :  { %v891_v22 = vpop.eup %890  ;;  %v669_v23 = vcombine.low %v885_v19, %v889_v21 }
 0x224   :  { %v670_v24 = vcombine.low %v887_v20, %v891_v22 }
 0x225   :  { %v677_v25 = vrot.slane %v669_v23, %v659_v51 }
 0x226   :  { %v684_v26 = vrot.slane %v670_v24, %v659_v51 }
 0x228   :  { %v685_v58 = vcombine.low %v677_v25, %v684_v26 }
 0x22a   :  { %689 = vst [vmem:[#allocation8 + $0x8] sm:$0xff] %v685_v58 }
 0x22b   :  { %969 = shalt.err (!%p966_p0)
}
 0x22c   :  { %s970_s10 = scalar_lea.hbm %s1096_s5, 256 }
 0x22d   :  { %p971_p1 = scmp.ne.s32.totalorder %s1096_s5, %s970_s10  ;;  %p974_p2 = scmp.lt.u32.totalorder %s970_s10, %s1096_s5 }
 0x22f   :  { %p976_p3 = pnand %p974_p2, %p971_p1 }
 0x231   :  { %979 = shalt.err (!%p976_p3)
}
 0x232   :  { %699 = dma.vmem_to_hbm [thread:$0]  %s697_s6, 256, %s1096_s5, [#allocation4]  }
 0x233   :  { %984 = dma.done.wait [#allocation4], 256  }
 0x234   :  { %985 = vsyncadd [#allocation4], 4294967040 }
 0x235   :  { %703 = vsyncpa [#allocation3], 1 }
 0x236   :  { %704 = vsyncpa [#allocation6], 1 }
 0x237   :  { %705 = vsyncpa [#allocation4], 1 }

</bundles_post_ra>
